<compile_context>
chip_gen: v7x
topology: tpu7x:2x2x1
jax: 0.10.0
libtpu: 0.0.40
codegen_flags: <defaults>
</compile_context>

<pallas_src>
import jax
import jax.numpy as jnp
from jax.experimental import pallas as pl
from jax.experimental.pallas import tpu as pltpu


def _round_up(x, m):
    return ((x + m - 1) // m) * m


def _pick_tile(size, align, lo, hi):
    """Tile size (multiple of `align`, in [lo, hi]) minimizing padding of `size`.

    If the aligned axis already fits within `hi`, use the whole axis as one block.
    Ties prefer the larger tile (fewer grid steps)."""
    size_a = _round_up(size, align)
    if size_a <= hi:
        return size_a, size_a
    best_t, best_pad = None, None
    for t in range(lo, hi + 1, align):
        padded = _round_up(size_a, t)
        if best_pad is None or padded < best_pad or (padded == best_pad and t > best_t):
            best_t, best_pad = t, padded
    return best_t, best_pad


def _pool_sum_kernel(x_ref, acc_ref):
    # x_ref:   (row_tile, hw_tile)  activation tile (native dtype)
    # acc_ref: (row_tile, 1) f32    resident across the spatial (reduction) axis
    @pl.when(pl.program_id(1) == 0)
    def _():
        acc_ref[...] = jnp.zeros_like(acc_ref)

    # Accumulate partial sums in f32 without materializing an f32 copy of the tile.
    acc_ref[...] += jnp.sum(x_ref[...], axis=1, keepdims=True, dtype=jnp.float32)


def _scale_kernel(x_ref, gate_ref, o_ref):
    # Pure read-scale-write stream in the native activation dtype.
    # gate_ref: (row_tile, 1) broadcasts along the lane (spatial) axis.
    o_ref[...] = x_ref[...] * gate_ref[...].astype(x_ref.dtype)


@jax.jit
def eca_forward(x, conv_weight):
    """x: (N, C, H, W).  conv_weight: (1, 1, K) PyTorch Conv1d weight (K odd, no bias)."""
    N, C, H, W = x.shape
    HW = H * W
    rows = N * C
    K = conv_weight.shape[-1]
    pad = K // 2
    w = conv_weight.reshape(K).astype(jnp.float32)

    row_tile, rows_pad = _pick_tile(rows, 8, 64, 256)
    hw_tile, hw_pad = _pick_tile(HW, 128, 512, 2048)

    x2 = x.reshape(rows, HW)
    x2p = jnp.pad(x2, ((0, rows_pad - rows), (0, hw_pad - HW)))  # zero pad (no-op if aligned)

    grid = (rows_pad // row_tile, hw_pad // hw_tile)
    itemsize = jnp.dtype(x.dtype).itemsize
    x_bytes = rows_pad * hw_pad * itemsize

    # ---------------- Pass 1: tiled global sum over the spatial axis ----------------
    sums = pl.pallas_call(
        _pool_sum_kernel,
        out_shape=jax.ShapeDtypeStruct((rows_pad, 1), jnp.float32),
        grid=grid,
        in_specs=[pl.BlockSpec((row_tile, hw_tile), lambda i, k: (i, k))],
        out_specs=pl.BlockSpec((row_tile, 1), lambda i, k: (i, 0)),
        compiler_params=pltpu.CompilerParams(
            dimension_semantics=("parallel", "arbitrary"),
            vmem_limit_bytes=32 * 1024 * 1024,
        ),
        cost_estimate=pl.CostEstimate(
            flops=rows_pad * hw_pad,
            transcendentals=0,
            bytes_accessed=x_bytes + rows_pad * 4,
        ),
    )(x2p)

    # ------- Tiny per-(N,C) gate in plain JAX: mean -> 5-tap conv -> sigmoid --------
    # Divide by the TRUE H*W so zero-padded spatial columns don't bias the mean.
    mean = (sums[:rows, 0] / HW).reshape(N, C)
    mp = jnp.pad(mean, ((0, 0), (pad, pad)))
    z = jnp.zeros_like(mean)
    for k in range(K):  # cross-correlation, exactly as PyTorch Conv1d (not flipped)
        z = z + w[k] * mp[:, k:k + C]
    gate = jax.nn.sigmoid(z).reshape(rows, 1).astype(jnp.float32)
    gate_p = jnp.pad(gate, ((0, rows_pad - rows), (0, 0)))

    # ---------------- Pass 2: lane-dense read-scale-write stream --------------------
    out = pl.pallas_call(
        _scale_kernel,
        out_shape=jax.ShapeDtypeStruct((rows_pad, hw_pad), x.dtype),
        grid=grid,
        in_specs=[
            pl.BlockSpec((row_tile, hw_tile), lambda i, k: (i, k)),
            pl.BlockSpec((row_tile, 1), lambda i, k: (i, 0)),
        ],
        out_specs=pl.BlockSpec((row_tile, hw_tile), lambda i, k: (i, k)),
        compiler_params=pltpu.CompilerParams(
            dimension_semantics=("parallel", "parallel"),
            vmem_limit_bytes=32 * 1024 * 1024,
        ),
        cost_estimate=pl.CostEstimate(
            flops=rows_pad * hw_pad,
            transcendentals=0,
            bytes_accessed=2 * x_bytes + rows_pad * 4,
        ),
    )(x2p, gate_p)
    # TODO(synk): optionally alias x2p -> out via input_output_aliases to save one HBM
    # allocation; skipped so the wrapper stays safe when padding is a no-op view of x.

    return out[:rows, :HW].reshape(N, C, H, W)


def eca_reference(x, conv_weight):
    """Pure-JAX reference matching the PyTorch forward exactly."""
    N, C, H, W = x.shape
    K = conv_weight.shape[-1]
    pad = K // 2
    w = conv_weight.reshape(K)
    y = jnp.mean(x, axis=(2, 3))                       # (N, C)
    yp = jnp.pad(y, ((0, 0), (pad, pad)))              # (N, C + 2*pad)
    z = jnp.zeros_like(y)
    for k in range(K):
        z = z + w[k] * yp[:, k:k + C]
    s = jax.nn.sigmoid(z)                              # (N, C)
    return x * s[:, :, None, None]


if __name__ == "__main__":
    key = jax.random.PRNGKey(0)
    kx, kw = jax.random.split(key)

    N, C, H, W = 2, 4, 16, 16
    x = jax.random.normal(kx, (N, C, H, W), dtype=jnp.float32)
    # Deterministic Conv1d(1, 1, kernel_size=5, bias=False) weight, shape (out=1, in=1, k=5)
    conv_weight = jax.random.normal(kw, (1, 1, 5), dtype=jnp.float32) * 0.3

    out = jax.block_until_ready(eca_forward(x, conv_weight))
    ref = eca_reference(x, conv_weight)

    assert out.shape == (N, C, H, W)
    assert jnp.allclose(out, ref, atol=1e-5, rtol=1e-5), "mismatch vs reference"

    print("KERNEL_OK")
</pallas_src>

<mosaic_0001>
module attributes {stable_mosaic.version = 11 : i64} {
  func.func @_scale_kernel(%arg0: i32, %arg1: i32, %arg2: memref<8x256xf32, #tpu.memory_space<vmem>>, %arg3: memref<8x1xf32, #tpu.memory_space<vmem>>, %arg4: memref<8x256xf32, #tpu.memory_space<vmem>>) attributes {dimension_semantics = [#tpu.dimension_semantics<parallel>, #tpu.dimension_semantics<parallel>], iteration_bounds = array<i64: 1, 1>, scalar_prefetch = 0 : i64, scratch_operands = 0 : i64, tpu.core_type = #tpu.core_type<tc>, window_params = [{transform_indices = @transform_0, window_bounds = array<i64: 8, 256>}, {transform_indices = @transform_1, window_bounds = array<i64: 8, 1>}, {transform_indices = @transform_2, window_bounds = array<i64: 8, 256>}]} {
    %c0 = arith.constant 0 : index
    %c0_0 = arith.constant 0 : index
    %0 = vector.load %arg2[%c0, %c0_0] : memref<8x256xf32, #tpu.memory_space<vmem>>, vector<8x256xf32>
    %c0_1 = arith.constant 0 : index
    %c0_2 = arith.constant 0 : index
    %1 = vector.load %arg3[%c0_1, %c0_2] : memref<8x1xf32, #tpu.memory_space<vmem>>, vector<8x1xf32>
    %2 = vector.broadcast %1 : vector<8x1xf32> to vector<8x256xf32>
    %3 = arith.mulf %0, %2 : vector<8x256xf32>
    %c0_3 = arith.constant 0 : index
    %c0_4 = arith.constant 0 : index
    %4 = vector.load %arg4[%c0_3, %c0_4] : memref<8x256xf32, #tpu.memory_space<vmem>>, vector<8x256xf32>
    tpu.vector_store %arg4[%c0_3, %c0_4], %3 {strides = array<i32>} : memref<8x256xf32, #tpu.memory_space<vmem>>, vector<8x256xf32>,
    return
  }
  func.func @transform_0(%arg0: i32, %arg1: i32) -> (i32, i32) {
    %c0_i32 = arith.constant 0 : i32
    return %arg0, %arg1 : i32, i32
  }
  func.func @transform_1(%arg0: i32, %arg1: i32) -> (i32, i32) {
    %c0_i32 = arith.constant 0 : i32
    %c0_i32_0 = arith.constant 0 : i32
    return %arg0, %c0_i32 : i32, i32
  }
  func.func @transform_2(%arg0: i32, %arg1: i32) -> (i32, i32) {
    %c0_i32 = arith.constant 0 : i32
    return %arg0, %arg1 : i32, i32
  }
}

module attributes {stable_mosaic.version = 11 : i64} {
  func.func @_pool_sum_kernel(%arg0: i32, %arg1: i32, %arg2: memref<8x256xf32, #tpu.memory_space<vmem>>, %arg3: memref<8x1xf32, #tpu.memory_space<vmem>>) attributes {dimension_semantics = [#tpu.dimension_semantics<parallel>, #tpu.dimension_semantics<arbitrary>], iteration_bounds = array<i64: 1, 1>, scalar_prefetch = 0 : i64, scratch_operands = 0 : i64, tpu.core_type = #tpu.core_type<tc>, window_params = [{transform_indices = @transform_0, window_bounds = array<i64: 8, 256>}, {transform_indices = @transform_1, window_bounds = array<i64: 8, 1>}]} {
    %c0_i32 = arith.constant 0 : i32
    %0 = arith.cmpi eq, %arg1, %c0_i32 : i32
    %1 = arith.extui %0 : i1 to i32
    %c0_i32_0 = arith.constant 0 : i32
    %2 = arith.cmpi ne, %1, %c0_i32_0 : i32
    scf.if %2 {
      %cst_6 = arith.constant 0.000000e+00 : f32
      %9 = vector.broadcast %cst_6 : f32 to vector<8x1xf32>
      %c0_7 = arith.constant 0 : index
      %c0_8 = arith.constant 0 : index
      %10 = vector.load %arg3[%c0_7, %c0_8] : memref<8x1xf32, #tpu.memory_space<vmem>>, vector<8x1xf32>
      tpu.vector_store %arg3[%c0_7, %c0_8], %9 {strides = array<i32>} : memref<8x1xf32, #tpu.memory_space<vmem>>, vector<8x1xf32>,
    } else {
    }
    %c0 = arith.constant 0 : index
    %c0_1 = arith.constant 0 : index
    %3 = vector.load %arg3[%c0, %c0_1] : memref<8x1xf32, #tpu.memory_space<vmem>>, vector<8x1xf32>
    %c0_2 = arith.constant 0 : index
    %c0_3 = arith.constant 0 : index
    %4 = vector.load %arg2[%c0_2, %c0_3] : memref<8x256xf32, #tpu.memory_space<vmem>>, vector<8x256xf32>
    %cst = arith.constant dense<0.000000e+00> : vector<8xf32>
    %5 = vector.multi_reduction <add>, %4, %cst [1] : vector<8x256xf32> to vector<8xf32>
    %6 = vector.shape_cast %5 : vector<8xf32> to vector<8x1xf32>
    %7 = arith.addf %3, %6 : vector<8x1xf32>
    %c0_4 = arith.constant 0 : index
    %c0_5 = arith.constant 0 : index
    %8 = vector.load %arg3[%c0_4, %c0_5] : memref<8x1xf32, #tpu.memory_space<vmem>>, vector<8x1xf32>
    tpu.vector_store %arg3[%c0_4, %c0_5], %7 {strides = array<i32>} : memref<8x1xf32, #tpu.memory_space<vmem>>, vector<8x1xf32>,
    return
  }
  func.func @transform_0(%arg0: i32, %arg1: i32) -> (i32, i32) {
    %c0_i32 = arith.constant 0 : i32
    return %arg0, %arg1 : i32, i32
  }
  func.func @transform_1(%arg0: i32, %arg1: i32) -> (i32, i32) {
    %c0_i32 = arith.constant 0 : i32
    %c0_i32_0 = arith.constant 0 : i32
    return %arg0, %c0_i32 : i32, i32
  }
}

</mosaic_0001>

<bundles_post_ra>
// kernel: eca_forward.2
= control target key start
LH: loop header
LB: loop body
LE: loop exit
PB: predicated region body
PF: predicated region fallthrough
CT: control target
= control target key end

     0   :  { %vm12_vm0 = vcmask 7168   ;;  %v28_v2 = vmov 0.0   ;;  %s54_s0 = inlined_call_operand.vmem [shape: f32[8,256], index: 0, kind: input, shape index: {}]   ;;  %s55_s1 = inlined_call_operand.vmem [shape: f32[8,1], index: 1, kind: output, shape index: {}]  }
   0x1   :  { %v15_v0 = vld [vmem:[%s54_s0] sm:$0xff]  ;;  %v16_v1 = vld [vmem:[%s54_s0 + $0x8] sm:$0xff]  ;;  %13 = vst.msk [vmem:[%s55_s1] sm:$0xff] %vm12_vm0, %v28_v2 }
   0x2   :  { %v17_v3 = vadd.f32 %v16_v1, %v15_v0 }
   0x4   :  { %18 = vadd.xlane.f32.xlu0 %v17_v3 }
   0x8   :  { %v14_v4 = vld [vmem:[%s55_s1] sm:$0xff] }
  0x91   :  { %v19_v5 = vpop.xlane.xlu0 %18 }
  0x92   :  { %v20_v6 = vadd.f32 %v19_v5, %v14_v4 }
  0x94   :  { %22 = vst.msk [vmem:[%s55_s1] sm:$0xff] %vm12_vm0, %v20_v6 }

// kernel: eca_forward.3
= control target key start
LH: loop header
LB: loop body
LE: loop exit
PB: predicated region body
PF: predicated region fallthrough
CT: control target
= control target key end

     0   :  { %v29_v0 = vmov 0   ;;  %s60_s1 = inlined_call_operand.vmem [shape: f32[8,1], index: 1, kind: input, shape index: {}]   ;;  %s61_s0 = inlined_call_operand.vmem [shape: f32[8,256], index: 0, kind: input, shape index: {}]   ;;  %s62_s2 = inlined_call_operand.vmem [shape: f32[8,256], index: 2, kind: output, shape index: {}]  }
   0x1   :  { %28 = vset.pattern.permute.xlu0 %v29_v0  ;;  %v13_v1 = vld [vmem:[%s60_s1] sm:$0xff]  ;;  %v12_v3 = vld [vmem:[%s61_s0 + $0x8] sm:$0xff] }
   0x2   :  { %16 = vperm.xlu0 %28, %v13_v1   ;;  %v11_v2 = vld [vmem:[%s61_s0] sm:$0xff] }
  0x81   :  { %v17_v4 = vpop.permute.xlu0 %16 }
  0x82   :  { %v19_v5 = vmul.f32 %v17_v4, %v11_v2  ;;  %v20_v6 = vmul.f32 %v17_v4, %v12_v3 }
  0x84   :  { %21 = vst [vmem:[%s62_s2] sm:$0xff] %v19_v5  ;;  %22 = vst [vmem:[%s62_s2 + $0x8] sm:$0xff] %v20_v6 }

</bundles_post_ra>
